<compile_context>
chip_gen: v6e
topology: v6e:2x2x1
jax: 0.10.0
libtpu: 0.0.40
codegen_flags: <defaults>
</compile_context>

<pallas_src>
import jax
import jax.numpy as jnp
from jax.experimental import pallas as pl
from jax.experimental.pallas import tpu as pltpu


def _attention_kernel(x_ref, w_ref, o_ref):
    # x_ref : (Bt, S, D)  VMEM  block of batch rows (ragged last block allowed)
    # w_ref : (1, D)      VMEM  attention weight as a lane-major row (resident)
    # o_ref : (Bt, D)     VMEM  context vectors for this block of rows
    x = x_ref[...]                                       # (Bt, S, D)
    w = w_ref[...]                                       # (1, D) -> broadcasts

    # scores[b, s] = <x[b, s, :], w>   (bias dropped: softmax is shift-invariant)
    # Multiply stays in the input dtype; only the lane reduction accumulates f32.
    scores = jnp.sum(x * w, axis=-1, dtype=jnp.float32)  # (Bt, S), S on lanes

    # Numerically-stable softmax over the sequence axis (torch dim=1).
    m = jnp.max(scores, axis=-1, keepdims=True)          # (Bt, 1)
    e = jnp.exp(scores - m)                               # (Bt, S)
    denom = jnp.sum(e, axis=-1, keepdims=True)            # (Bt, 1)

    # Unnormalized context via a batched MXU contraction, f32 accumulation in
    # the MXU (no explicit f32 (Bt, S, D) temporary). The MXU is otherwise idle
    # here; on v5e/v6e, if the M=1 vmatmul/vpop chain ever shows up in the
    # bundle dump, switch to the VPU form:
    #   ctx = jnp.sum(e[:, :, None].astype(x.dtype) * x, axis=1)
    ctx = jnp.einsum(
        "bqs,bsd->bqd",
        e[:, None, :].astype(x.dtype),
        x,
        preferred_element_type=jnp.float32,
    )[:, 0, :]                                            # (Bt, D)

    # One approximate reciprocal (EUP vrcp slot) per block, applied to the
    # small (Bt, D) context instead of the (Bt, S) weights.
    inv = pl.reciprocal(denom, approx=True)               # (Bt, 1)
    o_ref[...] = (ctx * inv).astype(o_ref.dtype)


def _vmem_limit_bytes():
    """Generation-aware scoped-VMEM budget: ~75% of physical, capped at 100 MiB.

    v7x (64 MiB physical) -> ~48 MiB; v5e/v6e (128 MiB physical) -> ~96 MiB.
    """
    try:
        cap = int(pltpu.get_tpu_info().vmem_capacity_bytes)
    except Exception:
        cap = 64 * 1024 * 1024  # conservative (v7x-sized) fallback
    return min(int(cap * 0.75), 100 * 1024 * 1024)


def _derive_block_b(B, S, D, itemsize, vmem_limit):
    """Pick the batch tile from the VMEM budget (big tiles: mem-bound kernel)."""
    # Sublane tile of the dtype: 8 rows f32, 16 bf16, 32 int8/fp8.
    sublane = {4: 8, 2: 16, 1: 32}.get(itemsize, 8)
    if B <= sublane:
        return B                          # full-extent batch block, single step
    per_row = (S * D + D) * itemsize      # one input row + one output row
    # Per step roughly: double-buffered input tile + elementwise temp (x*w) +
    # output tiles ~= 3 input tiles; keep that under ~60% of the budget to
    # leave headroom for compiler-internal scratch and the resident weight.
    bt = int(vmem_limit * 0.6) // (3 * per_row)
    bt = max(sublane, min(bt, 2048))
    bt = (bt // sublane) * sublane
    # Don't exceed the batch (rounded down to whole sublane tiles)...
    bt = min(bt, (B // sublane) * sublane)
    # ...and keep at least two grid steps so both v7x TensorCores get work.
    if B >= 2 * sublane:
        half = -(-((B + 1) // 2) // sublane) * sublane
        bt = min(bt, half)
    return max(sublane, bt)


def attention_forward(lstm_output, weight, bias=None, *, block_b=None):
    """lstm_output: [B, S, D]; weight: [D, 1]; bias: [1] -> context [B, D]."""
    B, S, D = lstm_output.shape
    itemsize = jnp.dtype(lstm_output.dtype).itemsize
    w_row = weight.reshape(1, D).astype(lstm_output.dtype)   # lane-major weight row
    # `bias` accepted for interface parity but unused: softmax over the sequence
    # axis is invariant to adding the same scalar to every position.
    del bias

    vmem_limit = _vmem_limit_bytes()
    Bt = int(block_b) if block_b is not None else _derive_block_b(
        B, S, D, itemsize, vmem_limit)
    grid_b = pl.cdiv(B, Bt)   # ragged last block; no jnp.pad (no extra HBM pass)

    # TODO(synk): for very long sequences (double-buffered Bt*S*D tile beyond
    # ~1/3 of the VMEM budget, earliest on v7x's 64 MiB) add an S grid axis
    # with online-softmax (m, l, acc) accumulators; whole-sequence blocks fit
    # comfortably for the shapes this module implies.

    cost = pl.CostEstimate(
        flops=4 * B * S * D,
        transcendentals=B * S,
        bytes_accessed=B * S * D * itemsize + B * D * itemsize + D * itemsize,
    )

    return pl.pallas_call(
        _attention_kernel,
        out_shape=jax.ShapeDtypeStruct((B, D), lstm_output.dtype),
        grid_spec=pltpu.PrefetchScalarGridSpec(
            num_scalar_prefetch=0,
            grid=(grid_b,),
            in_specs=[
                pl.BlockSpec((Bt, S, D), lambda i: (i, 0, 0)),   # batch tile (ragged edge ok)
                pl.BlockSpec((1, D), lambda i: (0, 0)),          # resident weight row
            ],
            out_specs=pl.BlockSpec((Bt, D), lambda i: (i, 0)),
        ),
        compiler_params=pltpu.CompilerParams(
            dimension_semantics=("parallel",),
            vmem_limit_bytes=vmem_limit,
        ),
        cost_estimate=cost,
    )(lstm_output, w_row)


def reference_forward(lstm_output, weight, bias):
    """Pure-JAX reference mirroring the PyTorch forward."""
    scores = jnp.einsum("bsd,do->bso", lstm_output, weight) + bias[0]   # (B, S, 1)
    attn = jax.nn.softmax(scores, axis=1)                               # (B, S, 1)
    return jnp.sum(attn * lstm_output, axis=1)                          # (B, D)


if __name__ == "__main__":
    key = jax.random.PRNGKey(0)

    # Case 1: tiny shape implied by the module (batch=2, seq=8, hidden_dim=16 -> D=32).
    # Case 2: batch not a multiple of the derived tile -> exercises the ragged last block.
    for (batch, seq, hidden_dim) in [(2, 8, 16), (37, 24, 16)]:
        D = hidden_dim * 2
        key, kx, kw, kb = jax.random.split(key, 4)

        lstm_output = jax.random.normal(kx, (batch, seq, D), dtype=jnp.float32)

        # nn.Linear(hidden_dim*2, 1): torch weight (1, D) stored transposed as (D, 1); bias (1,).
        bound = 1.0 / jnp.sqrt(jnp.float32(D))
        weight = jax.random.uniform(kw, (D, 1), jnp.float32, minval=-bound, maxval=bound)
        bias = jax.random.uniform(kb, (1,), jnp.float32, minval=-bound, maxval=bound)

        out = jax.block_until_ready(attention_forward(lstm_output, weight, bias))
        ref = reference_forward(lstm_output, weight, bias)

        assert out.shape == (batch, D), out.shape
        # Tolerance relaxed slightly for the approximate (EUP) reciprocal.
        assert jnp.allclose(out, ref, atol=2e-3, rtol=2e-3), (
            f"max abs err = {jnp.max(jnp.abs(out - ref))}"
        )

    print("KERNEL_OK")
</pallas_src>

<mosaic_0001>
module attributes {stable_mosaic.version = 11 : i64} {
  func.func @_attention_kernel(%arg0: i32, %arg1: memref<2x8x32xf32, #tpu.memory_space<vmem>>, %arg2: memref<1x32xf32, #tpu.memory_space<vmem>>, %arg3: memref<2x32xf32, #tpu.memory_space<vmem>>) attributes {dimension_semantics = [#tpu.dimension_semantics<parallel>], iteration_bounds = array<i64: 1>, scalar_prefetch = 0 : i64, scratch_operands = 0 : i64, tpu.core_type = #tpu.core_type<tc>, window_params = [{transform_indices = @transform_0, window_bounds = array<i64: 2, 8, 32>}, {pipeline_mode = #tpu.pipeline_mode<synchronous>, transform_indices = @transform_1, window_bounds = array<i64: 1, 32>}, {transform_indices = @transform_2, window_bounds = array<i64: 2, 32>}]} {
    %c0 = arith.constant 0 : index
    %c0_0 = arith.constant 0 : index
    %c0_1 = arith.constant 0 : index
    %0 = vector.load %arg1[%c0, %c0_0, %c0_1] : memref<2x8x32xf32, #tpu.memory_space<vmem>>, vector<2x8x32xf32>
    %c0_2 = arith.constant 0 : index
    %c0_3 = arith.constant 0 : index
    %1 = vector.load %arg2[%c0_2, %c0_3] : memref<1x32xf32, #tpu.memory_space<vmem>>, vector<1x32xf32>
    %2 = vector.shape_cast %1 : vector<1x32xf32> to vector<1x1x32xf32>
    %3 = vector.broadcast %2 : vector<1x1x32xf32> to vector<2x8x32xf32>
    %4 = arith.mulf %0, %3 : vector<2x8x32xf32>
    %cst = arith.constant dense<0.000000e+00> : vector<2x8xf32>
    %5 = vector.multi_reduction <add>, %4, %cst [2] : vector<2x8x32xf32> to vector<2x8xf32>
    %cst_4 = arith.constant dense<0xFF800000> : vector<2xf32>
    %6 = vector.multi_reduction <maximumf>, %5, %cst_4 [1] : vector<2x8xf32> to vector<2xf32>
    %7 = vector.shape_cast %6 : vector<2xf32> to vector<2x1xf32>
    %8 = vector.broadcast %7 : vector<2x1xf32> to vector<2x8xf32>
    %9 = arith.subf %5, %8 : vector<2x8xf32>
    %10 = math.exp %9 : vector<2x8xf32>
    %cst_5 = arith.constant dense<0.000000e+00> : vector<2xf32>
    %11 = vector.multi_reduction <add>, %10, %cst_5 [1] : vector<2x8xf32> to vector<2xf32>
    %12 = vector.shape_cast %11 : vector<2xf32> to vector<2x1xf32>
    %13 = vector.shape_cast %10 : vector<2x8xf32> to vector<2x1x8xf32>
    "tpu.trace_start"() <{level = 10 : i32, message = "bqs,bsd->bqd"}> : () -> ()
    %cst_6 = arith.constant dense<0.000000e+00> : vector<2x1x32xf32>
    %14 = tpu.matmul %13, %0, %cst_6 {dimension_numbers = #tpu.dot_dimension_numbers<[2], [1], [1], [2], [0, 0, 0, 1, 1, 2], [0], [0]>} : vector<2x1x8xf32>, vector<2x8x32xf32>, vector<2x1x32xf32> -> vector<2x1x32xf32>
    "tpu.trace_stop"() : () -> ()
    %15 = vector.shape_cast %14 : vector<2x1x32xf32> to vector<2x32xf32>
    %16 = tpu.reciprocal %12 {approx = true} : vector<2x1xf32> -> vector<2x1xf32>
    %17 = vector.broadcast %16 : vector<2x1xf32> to vector<2x32xf32>
    %18 = arith.mulf %15, %17 : vector<2x32xf32>
    %c0_7 = arith.constant 0 : index
    %c0_8 = arith.constant 0 : index
    %19 = vector.load %arg3[%c0_7, %c0_8] : memref<2x32xf32, #tpu.memory_space<vmem>>, vector<2x32xf32>
    tpu.vector_store %arg3[%c0_7, %c0_8], %18 {strides = array<i32>} : memref<2x32xf32, #tpu.memory_space<vmem>>, vector<2x32xf32>,
    return
  }
  func.func @transform_0(%arg0: i32) -> (i32, i32, i32) {
    %c0_i32 = arith.constant 0 : i32
    %c0_i32_0 = arith.constant 0 : i32
    %c0_i32_1 = arith.constant 0 : i32
    return %arg0, %c0_i32, %c0_i32_0 : i32, i32, i32
  }
  func.func @transform_1(%arg0: i32) -> (i32, i32) {
    %c0_i32 = arith.constant 0 : i32
    %c0_i32_0 = arith.constant 0 : i32
    %c0_i32_1 = arith.constant 0 : i32
    return %c0_i32, %c0_i32_0 : i32, i32
  }
  func.func @transform_2(%arg0: i32) -> (i32, i32) {
    %c0_i32 = arith.constant 0 : i32
    %c0_i32_0 = arith.constant 0 : i32
    return %arg0, %c0_i32 : i32, i32
  }
}

</mosaic_0001>

<bundles_post_ra>
// kernel: tpu_custom_call.1
= control target key start
LH: loop header
LB: loop body
LE: loop exit
PB: predicated region body
PF: predicated region fallthrough
CT: control target
= control target key end

     0   :  { %7 = vsyncpa [#allocation3], 0  ;;  %s387_s0 = inlined_call_operand.hbm [shape: f32[2,8,32], index: 0, kind: input, shape index: {}]   ;;  %s388_s1 = inlined_call_operand.vmem [shape: f32[1,32], index: 1, kind: input, shape index: {}]   ;;  %s389_s2 = inlined_call_operand.hbm [shape: f32[2,32], index: 2, kind: output, shape index: {}]  }
   0x1   :  { %8 = vsyncpa [#allocation4], 0  ;;  %s351_s9 = smov [#allocation2]  }
   0x2   :  { %s14_s10 = sshll.u32 %s351_s9, 4  ;;  %s15_s10 = int_to_ptr.vmem [resolvable:$true] %s14_s10 }
   0x3   :  { %s315_s11 = scalar_lea.vmem %s15_s10, 256  ;;  %p320_p1 = scmp.lt.s32.totalorder %s15_s10, %s15_s10 }
   0x4   :  { %p316_p0 = scmp.ne.s32.totalorder %s15_s10, %s315_s11  ;;  %p321_p2 = scmp.lt.s32.totalorder %s315_s11, %s315_s11 }
   0x6   :  { %p322_p3 = por %p321_p2, %p320_p1 }
   0x8   :  { %p323_p4 = pnand %p322_p3, %p316_p0 }
   0xa   :  { %326 = shalt.err (!%p323_p4)
}
   0xb   :  { %s352_s12 = smov 128   ;;  %s353_s13 = smov 8  }
   0xc   :  { %20 = dma.hbm_to_vmem [thread:$0]  %s387_s0, 256, %s15_s10, [#allocation3], %s352_s12, %s352_s12, %s353_s13  }
   0xd   :  { %347 = dma.done.wait [#allocation3], 256  }
   0xe   :  { %348 = vsyncadd [#allocation3], 4294967040  ;;  %v26_v0 = vld [vmem:[#allocation2] sm:$0xff]  ;;  %vm37_vm0 = vcmask 261120   ;;  %v27_v2 = vld [vmem:[#allocation2 + $0x8] sm:$0xff]  ;;  %v46_v7 = vlaneseq  ;;  %vm56_vm1 = vcmask 1041409  }
   0xf   :  { %v275_v1 = vld [vmem:[%s388_s1] ss:$0 sm:$0xff]  ;;  %vm59_vm2 = vcmask 58368   ;;  %v354_v17 = vmov 0   ;;  %v355_v27 = vmov 0.0   ;;  %vm356_vm3 = vmmov 0  }
  0x10   :  { %v35_v3 = vmul.f32 %v275_v1, %v26_v0  ;;  %v36_v4 = vmul.f32 %v275_v1, %v27_v2  ;;  %v47_v8 = vand.u32 127, %v46_v7  ;;  %v49_v9 = vshrl.u32 %v46_v7, 7  ;;  %300 = vset.pattern.permute.xlu0 %v354_v17  ;;  %299 = vset.pattern.permute.xlu1 %v354_v17  ;;  %s357_s0 = smov [#allocation5]  }
  0x11   :  { %282 = vmatprep.subr.mxu0 %v355_v27  ;;  %287 = vmatprep.subr.mxu1 %v355_v27  ;;  %vm101_vm4 = vcmask 64512   ;;  %s266_s1 = sshll.u32 %s357_s0, 4  ;;  %vm258_vm5 = vcmask 254976   ;;  %s267_s1 = int_to_ptr.vmem [resolvable:$true] %s266_s1 }
  0x12   :  { %v38_v5 = vsel %vm37_vm0, %v35_v3, 0.0  ;;  %v41_v6 = vsel %vm37_vm0, %v36_v4, 0.0  ;;  %v50_v11 = vsub.s32 %v47_v8, %v49_v9  ;;  %v66_v18 = vsub.s32 0, %v49_v9  ;;  %283 = vmatpush3.msra.mxu0 %v26_v0  ;;  %284 = vmatprep.mubr.msk.f32.mxu0 %vm356_vm3, %v355_v27  ;;  %s327_s18 = scalar_lea.vmem %s267_s1, 32  ;;  %p332_p6 = scmp.lt.s32.totalorder %s267_s1, %s267_s1 }
  0x13   :  { %39 = vadd.xlane.f32.xlu0 %v38_v5  ;;  %v70_v19 = vsub.s32 1, %v49_v9  ;;  %288 = vmatpush3.msra.mxu1 %v27_v2  ;;  %p328_p5 = scmp.ne.s32.totalorder %s267_s1, %s327_s18  ;;  %p333_p7 = scmp.lt.s32.totalorder %s327_s18, %s327_s18 }
  0x14   :  { %289 = vmatprep.mubr.msk.f32.mxu1 %vm356_vm3, %v355_v27 }
  0x15   :  { %p334_p8 = por %p333_p7, %p332_p6 }
  0x17   :  { %42 = vadd.xlane.f32.xlu0 %v41_v6  ;;  %p335_p9 = pnand %p334_p8, %p328_p5 }
  0x9c   :  { %v40_v10 = vpop.xlane.xlu0 %39 }
  0x9d   :  { %v51_v13 = vrot.slane %v40_v10, %v50_v11 }
  0xa0   :  { %v43_v12 = vpop.xlane.xlu0 %42 }
  0xa1   :  { %v55_v14 = vrot.slane %v43_v12, %v50_v11 }
  0xa3   :  { %v57_v15 = vsel %vm56_vm1, %v55_v14, %v51_v13 }
  0xa4   :  { %v60_v16 = vsel %vm59_vm2, %v57_v15, -inf }
  0xa5   :  { %61 = vmax.xlane.f32.xlu1 %v60_v16 }
 0x12e   :  { %v62_v20 = vpop.xlane.xlu1 %61 }
 0x12f   :  { %v67_v21 = vrot.slane %v62_v20, %v66_v18  ;;  %v71_v22 = vrot.slane %v62_v20, %v70_v19 }
 0x131   :  { %v74_v23 = vsub.f32 %v40_v10, %v67_v21  ;;  %v75_v24 = vsub.f32 %v43_v12, %v71_v22 }
 0x133   :  { %v76_v25 = vmul.f32 1.442695, %v74_v23  ;;  %v78_v26 = vmul.f32 1.442695, %v75_v24 }
 0x135   :  { %301 = vpow2.f32 %v76_v25 }
 0x136   :  { %303 = vpow2.f32 %v78_v26 }
 0x142   :  { %v302_v28 = vpop.eup %301 }
 0x143   :  { %v304_v29 = vpop.eup %303  ;;  %83 = vperm.xlu0 %300, %v302_v28  }
 0x144   :  { %86 = vperm.xlu1 %299, %v304_v29  }
 0x1be   :  { %v84_v30 = vpop.permute.xlu0 %83 }
 0x1bf   :  { %v87_v31 = vpop.permute.xlu1 %86  ;;  %v91_v32 = vrot.slane %v84_v30, %v50_v11 }
 0x1c0   :  { %v95_v33 = vrot.slane %v87_v31, %v50_v11 }
 0x1c1   :  { %285 = vmatmul.mubr.msk.f32.vlgmr.msra.gmra.mxu0 %vm101_vm4, %v91_v32 }
 0x1c2   :  { %290 = vmatmul.mubr.msk.f32.vlgmr.msra.gmra.mxu1 %vm101_vm4, %v95_v33  ;;  %v96_v34 = vsel %vm56_vm1, %v95_v33, %v91_v32 }
 0x1c3   :  { %v98_v35 = vsel %vm59_vm2, %v96_v34, 0.0 }
 0x1c4   :  { %99 = vadd.xlane.f32.xlu1 %v98_v35 }
 0x24d   :  { %v100_v36 = vpop.xlane.xlu1 %99 }
 0x24e   :  { %305 = vrcp.f32 %v100_v36 }
 0x25b   :  { %v306_v37 = vpop.eup %305 }
 0x25c   :  { %v248_v39 = vrot.slane %v306_v37, 1 }
 0x281   :  { %v170_v38 = vpop.f32.mrf.mxu0 }
 0x282   :  { %v242_v40 = vpop.f32.mrf.mxu1  ;;  %v251_v44 = vmul.f32 %v306_v37, %v170_v38 }
 0x283   :  { %v252_v41 = vmul.f32 %v248_v39, %v242_v40  ;;  %v286_v42 = vpop.f32.mrf.mxu0 }
 0x284   :  { %v291_v43 = vpop.f32.mrf.mxu1 }
 0x285   :  { %v255_v45 = vrot.slane %v252_v41, 7 }
 0x287   :  { %v256_v46 = vsel %vm56_vm1, %v255_v45, %v251_v44 }
 0x288   :  { %259 = vst.msk [vmem:[#allocation5] sm:$0x3] %vm258_vm5, %v256_v46 }
 0x289   :  { %338 = shalt.err (!%p335_p9)
}
 0x28a   :  { %269 = dma.vmem_to_hbm [thread:$0]  %s267_s1, 32, %s389_s2, [#allocation4]  }
 0x28b   :  { %349 = dma.done.wait [#allocation4], 32  }
 0x28c   :  { %350 = vsyncadd [#allocation4], 4294967264 }
 0x28d   :  { %273 = vsyncpa [#allocation3], 1 }
 0x28e   :  { %274 = vsyncpa [#allocation4], 1 }

</bundles_post_ra>
